<compile_context>
chip_gen: v7x
topology: tpu7x:2x2x1
jax: 0.10.0
libtpu: 0.0.40
codegen_flags: <defaults>
</compile_context>

<pallas_src>
import jax
import jax.numpy as jnp
from jax.experimental import pallas as pl
from jax.experimental.pallas import tpu as pltpu

_LANES = 128
_SUBLANES = 8


def _map_gamma_kernel(log_g_ref, d_ref, o_ref):
    # log_g_ref: SMEM (1,) f32 -- log(gamma), hoisted to the wrapper so the
    #            sigmoid/log EUP work is NOT re-done every grid step.
    # d_ref:     VMEM (block_rows, 128) f32 -- delay lengths (lane-dense tile)
    # o_ref:     VMEM (block_rows, 128) f32 -- gamma ** delays
    o_ref[...] = jnp.exp(d_ref[...] * log_g_ref[0])


def map_gamma_forward(x, delays, *, is_compressed=True, g_min=0.99, g_max=1.0,
                      min_kernel_elems=1024, block_rows=512):
    """Pallas implementation of map_gamma.forward.

    x      : array whose first element is the raw gamma parameter (e.g. shape (1,))
    delays : array of delay lengths (any shape); output has the same shape.
    """
    x0 = jnp.asarray(x, jnp.float32).reshape(-1)[0]
    d = jnp.asarray(delays, jnp.float32)
    orig_shape = d.shape
    n = d.size

    if is_compressed:
        s = jax.nn.sigmoid(x0)
        gamma = s * (g_max - g_min) + g_min
        # gamma - 1 formed without cancellation -> log1p keeps relative
        # precision near gamma ~ 1 (exponent `delays` can be O(1e3)).
        gm1 = s * (g_max - g_min) - (1.0 - g_min)
        log_gamma = jnp.log1p(gm1)
    else:
        gamma = x0
        # TODO(synk): torch pow semantics for non-positive base (0**0 == 1,
        # negative base with integer delays) are not reproduced by the
        # exp/log rewrite; the kernel path assumes gamma > 0.
        log_gamma = jnp.log(x0)

    if n < min_kernel_elems:
        # At the module's real size (a handful of delay lines) a pallas_call is
        # 100% launch/DMA overhead -- let XLA fuse the scalar power instead.
        return jnp.power(gamma, d)

    # --- Kernel path: lane/sublane-dense (rows, 128) layout, gridded -------
    rows = pl.cdiv(n, _LANES)
    br = min(block_rows, ((rows + _SUBLANES - 1) // _SUBLANES) * _SUBLANES)
    rows = ((rows + br - 1) // br) * br          # rows divisible by the block
    padded = rows * _LANES
    d2d = jnp.pad(d.reshape(-1), (0, padded - n)).reshape(rows, _LANES)
    log_g = jnp.reshape(log_gamma, (1,))         # scalar-prefetched into SMEM

    out = pl.pallas_call(
        _map_gamma_kernel,
        out_shape=jax.ShapeDtypeStruct((rows, _LANES), jnp.float32),
        grid_spec=pltpu.PrefetchScalarGridSpec(
            num_scalar_prefetch=1,
            grid=(rows // br,),
            in_specs=[pl.BlockSpec((br, _LANES), lambda i, lg: (i, 0))],
            out_specs=pl.BlockSpec((br, _LANES), lambda i, lg: (i, 0)),
        ),
        compiler_params=pltpu.CompilerParams(
            dimension_semantics=("parallel",)),
    )(log_g, d2d)

    return out.reshape(-1)[:n].reshape(orig_shape)


def _reference(x, delays, *, is_compressed=True, g_min=0.99, g_max=1.0):
    x0 = jnp.asarray(x, jnp.float32).reshape(-1)[0]
    d = jnp.asarray(delays, jnp.float32)
    if is_compressed:
        g = jax.nn.sigmoid(x0) * (g_max - g_min) + g_min
    else:
        g = x0
    return g ** d


if __name__ == "__main__":
    key = jax.random.PRNGKey(0)
    k_x, k_ds, k_db = jax.random.split(key, 3)

    # Module __init__: delays is a fixed vector of delay-line lengths, x is the
    # raw (pre-sigmoid) scalar parameter tensor of shape (1,).
    x = jax.random.normal(k_x, (1,), dtype=jnp.float32)

    # 1) Module-consistent tiny case (N=8): uses the no-kernel fast path.
    delays_small = jax.random.randint(k_ds, (8,), minval=500, maxval=2500).astype(jnp.float32)
    out_small = jax.block_until_ready(map_gamma_forward(x, delays_small, is_compressed=True))
    ref_small = _reference(x, delays_small, is_compressed=True)
    assert out_small.shape == delays_small.shape
    assert jnp.allclose(out_small, ref_small, rtol=1e-5, atol=1e-6), (out_small, ref_small)

    # 2) Larger delays vector (N=2048): exercises the Pallas kernel path
    #    (lane-dense (16,128) tiles, gridded, scalar-prefetched log(gamma)).
    delays_big = jax.random.randint(k_db, (2048,), minval=1, maxval=3000).astype(jnp.float32)
    out_big = jax.block_until_ready(map_gamma_forward(x, delays_big, is_compressed=True))
    ref_big = _reference(x, delays_big, is_compressed=True)
    assert out_big.shape == delays_big.shape
    assert jnp.allclose(out_big, ref_big, rtol=5e-4, atol=1e-6), (out_big, ref_big)

    # 3) Uncompressed branch (x[0] ** delays) with a positive base, kernel path.
    x_pos = jnp.array([0.997], dtype=jnp.float32)
    out2 = jax.block_until_ready(map_gamma_forward(x_pos, delays_big, is_compressed=False))
    ref2 = _reference(x_pos, delays_big, is_compressed=False)
    assert jnp.allclose(out2, ref2, rtol=5e-4, atol=1e-6), (out2, ref2)

    print("KERNEL_OK")
</pallas_src>

<mosaic_0001>
module attributes {stable_mosaic.version = 11 : i64} {
  func.func @_map_gamma_kernel(%arg0: i32, %arg1: memref<1xf32, #tpu.memory_space<smem>>, %arg2: memref<16x128xf32, #tpu.memory_space<vmem>>, %arg3: memref<16x128xf32, #tpu.memory_space<vmem>>) attributes {dimension_semantics = [#tpu.dimension_semantics<parallel>], iteration_bounds = array<i64: 1>, scalar_prefetch = 1 : i64, scratch_operands = 0 : i64, tpu.core_type = #tpu.core_type<tc>, window_params = [{transform_indices = @transform_0, window_bounds = array<i64: 16, 128>}, {transform_indices = @transform_1, window_bounds = array<i64: 16, 128>}]} {
    %c0 = arith.constant 0 : index
    %c0_0 = arith.constant 0 : index
    %0 = vector.load %arg2[%c0, %c0_0] : memref<16x128xf32, #tpu.memory_space<vmem>>, vector<16x128xf32>
    %c0_1 = arith.constant 0 : index
    %1 = memref.load %arg1[%c0_1] : memref<1xf32, #tpu.memory_space<smem>>
    %2 = vector.broadcast %1 : f32 to vector<16x128xf32>
    %3 = arith.mulf %0, %2 : vector<16x128xf32>
    %4 = math.exp %3 : vector<16x128xf32>
    %c0_2 = arith.constant 0 : index
    %c0_3 = arith.constant 0 : index
    %5 = vector.load %arg3[%c0_2, %c0_3] : memref<16x128xf32, #tpu.memory_space<vmem>>, vector<16x128xf32>
    tpu.vector_store %arg3[%c0_2, %c0_3], %4 {strides = array<i32>} : memref<16x128xf32, #tpu.memory_space<vmem>>, vector<16x128xf32>,
    return
  }
  func.func @transform_0(%arg0: i32, %arg1: memref<1xf32, #tpu.memory_space<smem>>) -> (i32, i32) {
    %c0_i32 = arith.constant 0 : i32
    %c0_i32_0 = arith.constant 0 : i32
    return %arg0, %c0_i32 : i32, i32
  }
  func.func @transform_1(%arg0: i32, %arg1: memref<1xf32, #tpu.memory_space<smem>>) -> (i32, i32) {
    %c0_i32 = arith.constant 0 : i32
    %c0_i32_0 = arith.constant 0 : i32
    return %arg0, %c0_i32 : i32, i32
  }
}

</mosaic_0001>

<bundles_post_ra>
// kernel: tpu_custom_call.1
= control target key start
LH: loop header
LB: loop body
LE: loop exit
PB: predicated region body
PF: predicated region fallthrough
CT: control target
= control target key end

     0   :  { %8 = vsyncpa [#allocation5], 0  ;;  %s162_s0 = inlined_call_operand.<no memory space> [shape: f32[1], index: 0, kind: input, shape index: {}]   ;;  %s163_s1 = inlined_call_operand.hbm [shape: f32[16,128], index: 1, kind: input, shape index: {}]   ;;  %s164_s2 = inlined_call_operand.hbm [shape: f32[16,128], index: 2, kind: output, shape index: {}]  }
   0x1   :  { %9 = vsyncpa [#allocation6], 0  ;;  %s110_s9 = smov [#allocation4]   ;;  %s62_s13 = scalar_lea.hbm %s163_s1, 256 }
   0x2   :  { %s15_s10 = sshll.u32 %s110_s9, 4  ;;  %p63_p0 = scmp.ne.s32.totalorder %s163_s1, %s62_s13  ;;  %s16_s10 = int_to_ptr.vmem [resolvable:$true] %s15_s10 }
   0x3   :  { %p66_p1 = scmp.lt.u32.totalorder %s62_s13, %s163_s1 }
   0x5   :  { %p68_p2 = pnand %p66_p1, %p63_p0 }
   0x7   :  { %71 = shalt.err (!%p68_p2)
}
   0x8   :  { %s72_s18 = scalar_lea.vmem %s16_s10, 256  ;;  %p77_p4 = scmp.lt.s32.totalorder %s16_s10, %s16_s10 }
   0x9   :  { %p73_p3 = scmp.ne.s32.totalorder %s16_s10, %s72_s18  ;;  %p78_p5 = scmp.lt.s32.totalorder %s72_s18, %s72_s18 }
   0xb   :  { %p79_p6 = por %p78_p5, %p77_p4 }
   0xd   :  { %p80_p7 = pnand %p79_p6, %p73_p3 }
   0xf   :  { %83 = shalt.err (!%p80_p7)
}
  0x10   :  { %s111_s19 = smov 128   ;;  %s112_s20 = smov 8  }
  0x11   :  { %21 = dma.hbm_to_vmem [thread:$0]  %s163_s1, 256, %s16_s10, [#allocation5], %s111_s19, %s111_s19, %s112_s20  }
  0x12   :  { %106 = dma.done.wait [#allocation5], 256  }
  0x13   :  { %107 = vsyncadd [#allocation5], 4294967040  ;;  %v28_v0 = vstv %s162_s0  ;;  %v25_v1 = vld [vmem:[#allocation4] sm:$0xff]  ;;  %v26_v2 = vld [vmem:[#allocation4 + $0x8] sm:$0xff]  ;;  %s113_s25 = smov [#allocation7]  }
  0x14   :  { %v29_v3 = vmul.f32 %v28_v0, %v25_v1  ;;  %v30_v4 = vmul.f32 %v28_v0, %v26_v2  ;;  %s42_s26 = sshll.u32 %s113_s25, 4  ;;  %s43_s26 = int_to_ptr.vmem [resolvable:$true] %s42_s26 }
  0x15   :  { %s84_s1 = scalar_lea.vmem %s43_s26, 256  ;;  %p89_p9 = scmp.lt.s32.totalorder %s43_s26, %s43_s26 }
  0x16   :  { %v31_v5 = vmul.f32 1.442695, %v29_v3  ;;  %v33_v6 = vmul.f32 1.442695, %v30_v4  ;;  %p85_p8 = scmp.ne.s32.totalorder %s43_s26, %s84_s1  ;;  %p90_p10 = scmp.lt.s32.totalorder %s84_s1, %s84_s1 }
  0x18   :  { %58 = vpow2.f32 %v31_v5  ;;  %p91_p11 = por %p90_p10, %p89_p9 }
  0x19   :  { %60 = vpow2.f32 %v33_v6 }
  0x1a   :  { %p92_p12 = pnand %p91_p11, %p85_p8 }
  0x22   :  { %v59_v7 = vpop.eup %58 }
  0x23   :  { %v61_v8 = vpop.eup %60  ;;  %35 = vst [vmem:[#allocation7] sm:$0xff] %v59_v7 }
  0x24   :  { %36 = vst [vmem:[#allocation7 + $0x8] sm:$0xff] %v61_v8 }
  0x25   :  { %95 = shalt.err (!%p92_p12)
}
  0x26   :  { %s96_s28 = scalar_lea.hbm %s164_s2, 256 }
  0x27   :  { %p97_p13 = scmp.ne.s32.totalorder %s164_s2, %s96_s28  ;;  %p100_p0 = scmp.lt.u32.totalorder %s96_s28, %s164_s2 }
  0x29   :  { %p102_p1 = pnand %p100_p0, %p97_p13 }
  0x2b   :  { %105 = shalt.err (!%p102_p1)
}
  0x2c   :  { %48 = dma.vmem_to_hbm [thread:$0]  %s43_s26, 256, %s164_s2, [#allocation6], %s111_s19, %s111_s19, %s112_s20  }
  0x2d   :  { %108 = dma.done.wait [#allocation6], 256  }
  0x2e   :  { %109 = vsyncadd [#allocation6], 4294967040 }
  0x2f   :  { %52 = vsyncpa [#allocation5], 1 }
  0x30   :  { %53 = vsyncpa [#allocation6], 1 }

</bundles_post_ra>
